<compile_context>
chip_gen: v6e
topology: v6e:2x2x1
jax: 0.10.0
libtpu: 0.0.40
codegen_flags: <defaults>
</compile_context>

<pallas_src>
import functools

import jax
import jax.numpy as jnp
from jax.experimental import pallas as pl
from jax.experimental.pallas import tpu as pltpu


def _residual_kernel(x_ref, wt_ref, shift_ref, o_ref, *, pad):
    """One batch tile of the Residual forward.

    x_ref    : [tn, Din]    input tile (matmul input AND residual branch)
    wt_ref   : [Din, Dout]  folded weight (W.T * bn_scale), resident across grid
    shift_ref: [1, Dout]    folded bias/shift ((b - mean) * scale + beta), f32
    o_ref    : [tn, Dout]   output tile
    """
    x = x_ref[...]

    # Linear + folded BatchNorm affine: one MXU matmul (f32 accumulation) and
    # one broadcast add.
    y = jnp.dot(x, wt_ref[...], preferred_element_type=jnp.float32)
    y = y + shift_ref[...]

    # ReLU
    y = jnp.maximum(y, 0.0)

    # Dropout: identity in eval mode.

    # Residual add with the zero-padded input, built in-register so the store
    # stays a single full-width (lane-dense) write.
    xf = x.astype(jnp.float32)
    if pad > 0:
        xf = jnp.concatenate(
            [xf, jnp.zeros((xf.shape[0], pad), jnp.float32)], axis=-1)
    o_ref[...] = (y + xf).astype(o_ref.dtype)


def residual_forward(x, w, b, bn_gamma, bn_beta, bn_mean, bn_var,
                     *, eps=1e-5, block_n=None):
    """x: [N, input_size]  ->  [N, output_size]"""
    n, input_size = x.shape
    output_size = w.shape[0]
    pad = output_size - input_size

    # --- one-time parameter folding (plain JAX, outside the kernel) ---------
    #   (x @ W.T + b) * scale + shift  ==  x @ (W.T * scale) + ((b-mean)*scale + beta)
    scale = bn_gamma / jnp.sqrt(bn_var + eps)                       # [Dout]
    wt = (w.T * scale[None, :]).astype(x.dtype)                     # [Din, Dout]
    shift = ((b - bn_mean) * scale + bn_beta).astype(jnp.float32)   # [Dout]
    shift2 = shift.reshape(1, output_size)

    # --- tiling --------------------------------------------------------------
    if block_n is None:
        # fixed row tile: multiple of 8, capped so several grid steps exist for
        # large batches (pipelining / megacore), but never larger than needed.
        block_n = min(512, ((n + 7) // 8) * 8)
    else:
        block_n = max(8, ((block_n + 7) // 8) * 8)
    grid = (pl.cdiv(n, block_n),)

    # --- cost estimate & VMEM budget -----------------------------------------
    dsize = jnp.dtype(x.dtype).itemsize
    flops = 2 * n * input_size * output_size
    bytes_accessed = (n * input_size * dsize                # x
                      + input_size * output_size * dsize    # weight
                      + output_size * 4                     # shift
                      + n * output_size * dsize)            # out
    cost = pl.CostEstimate(flops=flops, transcendentals=0,
                           bytes_accessed=bytes_accessed)

    in_tile = block_n * input_size * dsize
    out_tile = block_n * output_size * dsize
    w_bytes = input_size * output_size * dsize
    est = w_bytes + 2 * (in_tile + out_tile) + 8 * output_size * 4 + (1 << 20)
    # floor at 16 MiB (v5e default scoped), cap under v7x's 64 MiB physical.
    vmem_limit = int(min(max(est, 16 << 20), 60 << 20))

    kernel = functools.partial(_residual_kernel, pad=pad)

    out = pl.pallas_call(
        kernel,
        out_shape=jax.ShapeDtypeStruct((n, output_size), x.dtype),
        grid_spec=pltpu.PrefetchScalarGridSpec(
            num_scalar_prefetch=0,
            grid=grid,
            in_specs=[
                pl.BlockSpec((block_n, input_size), lambda i: (i, 0)),
                pl.BlockSpec((input_size, output_size), lambda i: (0, 0)),
                pl.BlockSpec((1, output_size), lambda i: (0, 0)),
            ],
            out_specs=pl.BlockSpec((block_n, output_size), lambda i: (i, 0)),
        ),
        compiler_params=pltpu.CompilerParams(
            dimension_semantics=("parallel",),
            vmem_limit_bytes=vmem_limit),
        cost_estimate=cost,
    )(x, wt, shift2)
    return out


def make_params(input_size, output_size):
    """Deterministic parameter init matching Residual.__init__(init='eye')."""
    w = jnp.zeros((output_size, input_size), jnp.float32)
    eye = jnp.eye(min(output_size, input_size), dtype=jnp.float32)
    w = w.at[:input_size, :input_size].set(eye)
    b = jnp.zeros((output_size,), jnp.float32)
    bn_gamma = jnp.ones((output_size,), jnp.float32)
    bn_beta = jnp.zeros((output_size,), jnp.float32)
    bn_mean = jnp.zeros((output_size,), jnp.float32)
    bn_var = jnp.ones((output_size,), jnp.float32)
    return w, b, bn_gamma, bn_beta, bn_mean, bn_var


def make_random_params(key, input_size, output_size):
    """Random params (exercises the BatchNorm folding)."""
    k1, k2, k3, k4, k5, k6 = jax.random.split(key, 6)
    w = 0.1 * jax.random.normal(k1, (output_size, input_size), jnp.float32)
    b = 0.1 * jax.random.normal(k2, (output_size,), jnp.float32)
    bn_gamma = 1.0 + 0.1 * jax.random.normal(k3, (output_size,), jnp.float32)
    bn_beta = 0.1 * jax.random.normal(k4, (output_size,), jnp.float32)
    bn_mean = 0.1 * jax.random.normal(k5, (output_size,), jnp.float32)
    bn_var = 0.5 + jnp.abs(jax.random.normal(k6, (output_size,), jnp.float32))
    return w, b, bn_gamma, bn_beta, bn_mean, bn_var


def reference_forward(x, w, b, bn_gamma, bn_beta, bn_mean, bn_var, eps=1e-5):
    """Pure-JAX reference (eval-mode BN, identity dropout)."""
    pad_size = w.shape[0] - x.shape[1]
    temp = jnp.pad(x, ((0, 0), (0, pad_size)))
    y = x @ w.T + b
    y = (y - bn_mean) / jnp.sqrt(bn_var + eps) * bn_gamma + bn_beta
    y = jnp.maximum(y, 0.0)
    return y + temp


if __name__ == "__main__":
    key = jax.random.PRNGKey(0)
    kx, kp = jax.random.split(key)

    batch = 24
    input_size = 32
    output_size = 64

    x = jax.random.normal(kx, (batch, input_size), dtype=jnp.float32)

    # Test 1: module-default 'eye' init (exact path) with multiple grid steps.
    params_eye = make_params(input_size, output_size)
    out = jax.block_until_ready(residual_forward(x, *params_eye, block_n=8))
    ref = reference_forward(x, *params_eye)
    assert out.shape == (batch, output_size), out.shape
    assert jnp.allclose(out, ref, atol=1e-5, rtol=1e-5), (
        float(jnp.max(jnp.abs(out - ref))))

    # Test 2: random params (verifies BatchNorm folding into weight/shift),
    # default block_n (single grid step for this small batch).
    params_rand = make_random_params(kp, input_size, output_size)
    out2 = jax.block_until_ready(residual_forward(x, *params_rand))
    ref2 = reference_forward(x, *params_rand)
    assert jnp.allclose(out2, ref2, atol=1e-4, rtol=1e-4), (
        float(jnp.max(jnp.abs(out2 - ref2))))

    print("KERNEL_OK")
</pallas_src>

<mosaic_0001>
module attributes {stable_mosaic.version = 11 : i64} {
  func.func @_residual_kernel(%arg0: i32, %arg1: memref<8x32xf32, #tpu.memory_space<vmem>>, %arg2: memref<32x64xf32, #tpu.memory_space<vmem>>, %arg3: memref<1x64xf32, #tpu.memory_space<vmem>>, %arg4: memref<8x64xf32, #tpu.memory_space<vmem>>) attributes {dimension_semantics = [#tpu.dimension_semantics<parallel>], iteration_bounds = array<i64: 3>, scalar_prefetch = 0 : i64, scratch_operands = 0 : i64, tpu.core_type = #tpu.core_type<tc>, window_params = [{transform_indices = @transform_0, window_bounds = array<i64: 8, 32>}, {pipeline_mode = #tpu.pipeline_mode<synchronous>, transform_indices = @transform_1, window_bounds = array<i64: 32, 64>}, {pipeline_mode = #tpu.pipeline_mode<synchronous>, transform_indices = @transform_2, window_bounds = array<i64: 1, 64>}, {transform_indices = @transform_3, window_bounds = array<i64: 8, 64>}]} {
    %c0 = arith.constant 0 : index
    %c0_0 = arith.constant 0 : index
    %0 = vector.load %arg1[%c0, %c0_0] : memref<8x32xf32, #tpu.memory_space<vmem>>, vector<8x32xf32>
    %c0_1 = arith.constant 0 : index
    %c0_2 = arith.constant 0 : index
    %1 = vector.load %arg2[%c0_1, %c0_2] : memref<32x64xf32, #tpu.memory_space<vmem>>, vector<32x64xf32>
    %cst = arith.constant dense<0.000000e+00> : vector<8x64xf32>
    %2 = tpu.matmul %0, %1, %cst {dimension_numbers = #tpu.dot_dimension_numbers<[1], [0], [0], [1], [0, 0, 1, 1], [], []>} : vector<8x32xf32>, vector<32x64xf32>, vector<8x64xf32> -> vector<8x64xf32>
    %c0_3 = arith.constant 0 : index
    %c0_4 = arith.constant 0 : index
    %3 = vector.load %arg3[%c0_3, %c0_4] : memref<1x64xf32, #tpu.memory_space<vmem>>, vector<1x64xf32>
    %4 = vector.broadcast %3 : vector<1x64xf32> to vector<8x64xf32>
    %5 = arith.addf %2, %4 : vector<8x64xf32>
    %cst_5 = arith.constant 0.000000e+00 : f32
    %6 = vector.broadcast %cst_5 : f32 to vector<8x64xf32>
    %7 = arith.maximumf %5, %6 : vector<8x64xf32>
    %cst_6 = arith.constant 0.000000e+00 : f32
    %8 = vector.broadcast %cst_6 : f32 to vector<8x32xf32>
    %9 = tpu.concatenate %0, %8 in 1 : vector<8x32xf32>, vector<8x32xf32> -> vector<8x64xf32>
    %10 = arith.addf %7, %9 : vector<8x64xf32>
    %c0_7 = arith.constant 0 : index
    %c0_8 = arith.constant 0 : index
    %11 = vector.load %arg4[%c0_7, %c0_8] : memref<8x64xf32, #tpu.memory_space<vmem>>, vector<8x64xf32>
    tpu.vector_store %arg4[%c0_7, %c0_8], %10 {strides = array<i32>} : memref<8x64xf32, #tpu.memory_space<vmem>>, vector<8x64xf32>,
    return
  }
  func.func @transform_0(%arg0: i32) -> (i32, i32) {
    %c0_i32 = arith.constant 0 : i32
    %c0_i32_0 = arith.constant 0 : i32
    return %arg0, %c0_i32 : i32, i32
  }
  func.func @transform_1(%arg0: i32) -> (i32, i32) {
    %c0_i32 = arith.constant 0 : i32
    %c0_i32_0 = arith.constant 0 : i32
    %c0_i32_1 = arith.constant 0 : i32
    return %c0_i32, %c0_i32_0 : i32, i32
  }
  func.func @transform_2(%arg0: i32) -> (i32, i32) {
    %c0_i32 = arith.constant 0 : i32
    %c0_i32_0 = arith.constant 0 : i32
    %c0_i32_1 = arith.constant 0 : i32
    return %c0_i32, %c0_i32_0 : i32, i32
  }
  func.func @transform_3(%arg0: i32) -> (i32, i32) {
    %c0_i32 = arith.constant 0 : i32
    %c0_i32_0 = arith.constant 0 : i32
    return %arg0, %c0_i32 : i32, i32
  }
}

</mosaic_0001>

<bundles_post_ra>
// kernel: tpu_custom_call.1
= control target key start
LH: loop header
LB: loop body
LE: loop exit
PB: predicated region body
PF: predicated region fallthrough
CT: control target
= control target key end

     0   :  { %8 = vsyncpa [#allocation3], 0  ;;  %s789_s0 = inlined_call_operand.hbm [shape: f32[24,32], index: 0, kind: input, shape index: {}]   ;;  %s790_s1 = inlined_call_operand.hbm [shape: f32[32,64], index: 1, kind: input, shape index: {}]   ;;  %s791_s2 = inlined_call_operand.vmem [shape: f32[1,64], index: 2, kind: input, shape index: {}]   ;;  %s792_s3 = inlined_call_operand.hbm [shape: f32[24,64], index: 3, kind: output, shape index: {}]  }
   0x1   :  { %10 = vsyncpa [#allocation3 + $0x1], 0 }
   0x2   :  { %11 = vsyncpa [#allocation6], 0 }
   0x3   :  { %12 = vsyncpa [#allocation4], 0 }
   0x4   :  { %14 = vsyncpa [#allocation4 + $0x1], 0  ;;  %s630_s12 = smov 0   ;;  %s632_s13 = smov 0  }
   0x5   :  { %s634_s14 = smov 0   ;;  %s636_s15 = smov 0  }
   0x6 LB: > { %s651_s16 = sadd.s32 4294967295, %s601_s15   ;;  %s386_s17 = sadd.s32 4294967294, %s601_s15   ;;  %s601_s15 = sphi %s636_s15, %s813_s15   ;;  %s597_s14 = sphi %s634_s14, %s812_s14   ;;  %s593_s13 = sphi %s632_s13, %s811_s13   ;;  %s589_s12 = sphi %s630_s12, %s810_s12  }
   0x7   : > { %p40_p0 = scmp.ne.s32.totalorder %s593_s13, %s589_s12  ;;  %p793_p1 = scmp.eq.s32.totalorder %s651_s16, 0 }
   0x8   : > { %p112_p3 = scmp.eq.s32.totalorder %s386_s17, 2  ;;  %p387_p5 = scmp.ge.s32.totalorder %s601_s15, 1 }
   0x9   : > { %p660_p4 = por %p793_p1, %p40_p0  ;;  %p119_p7 = scmp.lt.s32.totalorder %s601_s15, 4 }
   0xa   : > { %p665_p6 = por %p112_p3, %p40_p0  ;;  %s603_s21 = smov [#allocation5]  }
   0xb   : > { %s797_s18 = scalar_select %p660_p4, 1, 0 }
   0xc   : > { %s798_s19 = scalar_select %p665_p6, 1, 0 }
   0xd   : > { %p670_p8 = pnand %p387_p5, %p119_p7  ;;  %s131_s22 = sshll.u32 %s603_s21, 4  ;;  %s132_s22 = int_to_ptr.vmem [resolvable:$true] %s131_s22 }
   0xe   : > { %s683_s24 = sadd.s32 1, %s601_s15   ;;  %s27_s25 = sadd.s32 1, %s597_s14 }
   0xf   : > { %s799_s20 = scalar_select %p670_p8, 1, 0 }
  0x10   : > { %p426_p9 = pneg %p670_p8  ;;  %s24_s26 = ssub.s32 %s601_s15, %s683_s24 }
  0x11   : > { %s490_s27 = scalar_lea.vmem %s132_s22, 512  ;;  %p498_p3 = scmp.lt.s32.totalorder %s132_s22, %s132_s22 }
  0x12   : > { %p678_p10 = pnand %p426_p9, %p793_p1  ;;  %p491_p12 = scmp.ne.s32.totalorder %s132_s22, %s490_s27 }
  0x13   : > { %p499_p5 = scmp.lt.s32.totalorder %s490_s27, %s490_s27 }
  0x14   : > { %p481_p11 = pneg %p678_p10 }
  0x15   : > { %p500_p7 = por %p499_p5, %p498_p3 }
  0x16   : > { %p493_p13 = pnand %p491_p12, %p481_p11 }
  0x18   : > { %p494_p0 = pneg %p493_p13 }
  0x1a   : > { %p501_p2 = pnand %p500_p7, %p494_p0 }
  0x1c   : > { %504 = shalt.err (!%p501_p2)
}
  0x1d   : > { %s604_s28 = smov 128   ;;  %s605_s29 = smov 8  }
  0x1e   : > { %429 = dma.hbm_to_vmem [thread:$0]  (!%p678_p10), %s790_s1, 512, %s132_s22, [#allocation6], %s604_s28, %s604_s28, %s605_s29  }
  0x1f   : > { %p25_p9 = scmp.eq.s32.totalorder %s24_s26, 0  ;;  %p34_p11 = scmp.ne.s32.totalorder %s597_s14, %s593_s13 }
  0x20   : > { %p35_p12 = scmp.eq.s32.totalorder %s601_s15, 0  ;;  %p439_p2 = scmp.lt.s32.totalorder %s601_s15, 3 }
  0x21   : > { %s700_s5 = scalar_select %p25_p9, %s597_s14, %s27_s25  }
  0x22   : > { %p36_p13 = por %p35_p12, %p34_p11  ;;  %p801_p0 = scmp.eq.s32.totalorder %s651_s16, 2 }
  0x23   : > { %s148_s7 = sand.u32 1, %s597_s14   ;;  %s391_s8 = sshll.u32 %s601_s15, 7 }
  0x24   : > { %p704_p3 = por %p801_p0, %p34_p11  ;;  %s390_s9 = sshll.u32 %s148_s7, 3 }
  0x25   : > { %s713_s17 = scalar_lea.hbm %s789_s0, %s391_s8  ;;  %s152_s21 = scalar_lea.vmem [#allocation2], %s390_s9 }
  0x26   : > { %s802_s6 = scalar_select %p704_p3, 1, 0 }
  0x27   : > { %s159_s22 = sshll.u32 %s152_s21, 4  ;;  %p715_p10 = pnand %p439_p2, %p36_p13  ;;  %s160_s22 = int_to_ptr.vmem [resolvable:$true] %s159_s22 }
  0x28   : > { %s149_s25 = scalar_lea.sflag [#allocation3], %s148_s7  ;;  %s505_s26 = scalar_lea.hbm %s713_s17, 128 }
  0x29   : > { %p506_p5 = scmp.ne.s32.totalorder %s713_s17, %s505_s26  ;;  %p507_p7 = pneg %p715_p10 }
  0x2a   : > { %s510_s29 = scalar_lea.hbm %s789_s0, 384  ;;  %p511_p12 = scmp.lt.s32.totalorder %s713_s17, %s789_s0 }
  0x2b   : > { %p508_p9 = pnand %p507_p7, %p506_p5  ;;  %p512_p2 = scmp.lt.s32.totalorder %s510_s29, %s505_s26 }
  0x2d   : > { %p509_p11 = pneg %p508_p9  ;;  %p513_p13 = por %p512_p2, %p511_p12 }
  0x2f   : > { %p514_p0 = pnand %p513_p13, %p509_p11 }
  0x31   : > { %517 = shalt.err (!%p514_p0)
}
  0x32   : > { %s518_s8 = scalar_lea.vmem %s160_s22, 128  ;;  %s606_s7 = smov [#allocation2]  }
  0x33   : > { %p519_p1 = scmp.ne.s32.totalorder %s160_s22, %s518_s8  ;;  %s523_s9 = sshll.u32 %s606_s7, 4  ;;  %s524_s9 = int_to_ptr.vmem [resolvable:$false] %s523_s9 }
  0x34   : > { %s525_s10 = scalar_lea.vmem %s524_s9, 256  ;;  %p526_p5 = scmp.lt.s32.totalorder %s160_s22, %s524_s9 }
  0x35   : > { %p521_p6 = pnand %p519_p1, %p507_p7  ;;  %p527_p9 = scmp.lt.s32.totalorder %s525_s10, %s518_s8 }
  0x37   : > { %p522_p3 = pneg %p521_p6  ;;  %p528_p4 = por %p527_p9, %p526_p5 }
  0x39   : > { %p529_p8 = pnand %p528_p4, %p522_p3 }
  0x3b   : > { %532 = shalt.err (!%p529_p8)
}
  0x3c   : > { %433 = dma.hbm_to_vmem [thread:$0]  (!%p715_p10), %s713_s17, 128, %s160_s22, %s149_s25  }
  0x3d   : > { %p804_p11 = scmp.ne.s32.totalorder %s799_s20, 0 }
  0x3e   : > { %s736_s11 = sand.u32 (!%p804_p11), 1, %s593_s13   ;;  %p805_p1 = scmp.ne.s32.totalorder (!%p804_p11), %s797_s18, 0 }
  0x3f   : > { %168 = sbr.rel (%p804_p11) target bundleno = 293 (0x125), region = 32  ;;  %s393_s21 = sshll.u32 (!%p804_p11), %s736_s11, 3 }
  0x40   : > { %s171_s26 = scalar_lea.sflag (!%p804_p11), [#allocation3], %s736_s11  ;;  %s174_s27 = scalar_lea.vmem (!%p804_p11), [#allocation2], %s393_s21 }
  0x44   : > { %576 = dma.done.wait (%p805_p1), %s171_s26, 128  }
  0x45   : > { %578 = vsyncadd (%p805_p1), %s171_s26, 4294967168  ;;  %p806_p4 = scmp.eq.s32.totalorder %s651_s16, 0 }
  0x47   : > { %580 = dma.done.wait (%p806_p4), [#allocation6], 512   ;;  %p807_p6 = pmov %p806_p4 }
  0x48   : > { %v607_v0 = vmov 0.0   ;;  %vm608_vm0 = vmmov 0   ;;  %v205_v1 = vld [vmem:[#allocation5 + $0x18] sm:$0xff]  ;;  %v204_v2 = vld [vmem:[#allocation5 + $0x10] sm:$0xff]  ;;  %v203_v3 = vld [vmem:[#allocation5 + $0x8] sm:$0xff]  ;;  %vm213_vm1 = vcmask 261120  }
  0x49   : > { %582 = vsyncadd (%p807_p6), [#allocation6], 4294966784  ;;  %407 = vmatprep.subr.mxu0 %v607_v0  ;;  %415 = vmatprep.mubr.msk.f32.mxu0 %vm608_vm0, %v607_v0  ;;  %v202_v4 = vld [vmem:[#allocation5] sm:$0xff]  ;;  %v201_v5 = vld [vmem:[%s174_s27] sm:$0xff]  ;;  %s399_s17 = sshll.u32 %s651_s16, 7  ;;  %s200_s22 = scalar_lea.vmem [#allocation7], %s393_s21 }
  0x4a   : > { %408 = vmatpush3.msra.mxu0 %v205_v1  ;;  %v396_v6 = vld [vmem:[%s791_s2] ss:$0 sm:$0xff]  ;;  %v288_v9 = vsel %vm213_vm1, %v201_v5, 0.0  ;;  %s306_s23 = sshll.u32 %s200_s22, 4  ;;  %vm290_vm2 = vcmask 523264   ;;  %s304_s29 = scalar_lea.hbm %s792_s3, %s399_s17  ;;  %s307_s23 = int_to_ptr.vmem [resolvable:$true] %s306_s23 }
  0x4b   : > { %409 = vmatprep.subr.mxu0 %v607_v0  ;;  %s293_s30 = scalar_lea.sflag [#allocation4], %s736_s11  ;;  %s533_s4 = scalar_lea.vmem %s307_s23, 128 }
  0x4c   : > { %410 = vmatpush3.msra.mxu0 %v204_v2  ;;  %p534_p8 = scmp.ne.s32.totalorder %s307_s23, %s533_s4  ;;  %p808_p3 = scmp.ne.s32.totalorder %s802_s6, 0 }
  0x4d   : > { %411 = vmatprep.subr.mxu0 %v607_v0  ;;  %s609_s8 = smov [#allocation7]  }
  0x4e   : > { %412 = vmatpush3.msra.mxu0 %v203_v3  ;;  %p535_p10 = pnand %p534_p8, %p808_p3  ;;  %s537_s16 = sshll.u32 %s609_s8, 4  ;;  %s538_s16 = int_to_ptr.vmem [resolvable:$false] %s537_s16 }
  0x4f   : > { %413 = vmatprep.subr.mxu0 %v607_v0  ;;  %s539_s7 = scalar_lea.vmem %s538_s16, 256  ;;  %p540_p12 = scmp.lt.s32.totalorder %s307_s23, %s538_s16 }
  0x50   : > { %414 = vmatpush3.msra.mxu0 %v202_v4  ;;  %p536_p7 = pneg %p535_p10  ;;  %p541_p2 = scmp.lt.s32.totalorder %s539_s7, %s533_s4 }
  0x51   : > { %416 = vmatmul.mubr.msk.f32.vlgmr.msra.gmra.mxu0 %vm213_vm1, %v201_v5 }
  0x52   : > { %p542_p13 = por %p541_p2, %p540_p12 }
  0x54   : > { %p543_p0 = pnand %p542_p13, %p536_p7 }
 0x111   : > { %v283_v7 = vpop.f32.mrf.mxu0 }
 0x112   : > { %v284_v8 = vadd.f32 %v396_v6, %v283_v7 }
 0x113   : > { %v417_v10 = vpop.f32.mrf.mxu0 }
 0x114   : > { %v287_v11 = vmax.f32 %v284_v8, 0.0 }
 0x116   : > { %v289_v12 = vadd.f32 %v288_v9, %v287_v11 }
 0x118   : > { %291 = vst.msk [vmem:[%s200_s22] sm:$0xff] %vm290_vm2, %v289_v12 }
 0x119   : > { %546 = shalt.err (!%p543_p0)
}
 0x11a   : > { %s547_s9 = scalar_lea.hbm %s304_s29, 128  ;;  %s551_s21 = scalar_lea.hbm %s792_s3, 384 }
 0x11b   : > { %p548_p5 = scmp.ne.s32.totalorder %s304_s29, %s547_s9  ;;  %p552_p1 = scmp.lt.s32.totalorder %s304_s29, %s792_s3 }
 0x11c   : > { %p553_p4 = scmp.lt.s32.totalorder %s551_s21, %s547_s9 }
 0x11d   : > { %p549_p9 = pnand %p548_p5, %p808_p3 }
 0x11e   : > { %p554_p6 = por %p553_p4, %p552_p1 }
 0x11f   : > { %p550_p11 = pneg %p549_p9 }
 0x121   : > { %p555_p8 = pnand %p554_p6, %p550_p11 }
 0x123   : > { %558 = shalt.err (!%p555_p8)
}
 0x124   : > { %424 = dma.vmem_to_hbm [thread:$0]  (%p808_p3), %s307_s23, 128, %s304_s29, %s293_s30  }
 0x125 PF: > { %p441_p10 = scmp.ge.s32.totalorder %s601_s15, 2  ;;  %s318_s18 = sand.u32 1, %s589_s12  }
 0x126   : > { %p809_p7 = scmp.ne.s32.totalorder %s798_s19, 0  ;;  %s319_s20 = scalar_lea.sflag [#allocation4], %s318_s18 }
 0x128   : > { %p435_p12 = pnand %p441_p10, %p809_p7 }
 0x12a   : > { %p436_p2 = pneg %p435_p12 }
 0x12c   : > { %584 = dma.done.wait (%p436_p2), %s319_s20, 128  }
 0x12d   : > { %586 = vsyncadd (%p436_p2), %s319_s20, 4294967168  ;;  %p17_p13 = scmp.ge.s32.totalorder %s683_s24, 5   ;;  %s810_s12 = smov %s593_s13 }
 0x12e   : > { %s811_s13 = smov %s597_s14  ;;  %s812_s14 = smov %s700_s5 }
 0x12f   : > { %s813_s15 = smov %s683_s24  ;;  %19 = sbr.rel (!%p17_p13) target bundleno = 6 (0x6), region = 81 }
 0x134   :  { %324 = vsyncpa [#allocation3], 1 }
 0x135   :  { %326 = vsyncpa [#allocation3 + $0x1], 1 }
 0x136   :  { %327 = vsyncpa [#allocation6], 1 }
 0x137   :  { %328 = vsyncpa [#allocation4], 1 }
 0x138   :  { %330 = vsyncpa [#allocation4 + $0x1], 1 }

</bundles_post_ra>
